<compile_context>
chip_gen: v5e
topology: v5e:2x2
jax: 0.10.0
libtpu: 0.0.40
codegen_flags: <defaults>
</compile_context>

<pallas_src>
import functools

import jax
import jax.numpy as jnp
from jax import lax
from jax.experimental import pallas as pl
from jax.experimental.pallas import tpu as pltpu

_BN_EPS = 1e-5


def _fused_ab_into(e1r_ref, e1i_ref, rr_ref, ri_ref, bn_ref, ab_sc):
    """BatchNorm (eval) + ComplEx fusion -> ab_sc = [a | b] (TB, 2D) bf16 scratch."""
    # bn rows: [gamma_r, beta_r, mean_r, var_r, gamma_i, beta_i, mean_i, var_i]
    gr, br_, mr, vr = bn_ref[0:1, :], bn_ref[1:2, :], bn_ref[2:3, :], bn_ref[3:4, :]
    gi, bi_, mi, vi = bn_ref[4:5, :], bn_ref[5:6, :], bn_ref[6:7, :], bn_ref[7:8, :]
    inv_r = gr * lax.rsqrt(vr + _BN_EPS)
    inv_i = gi * lax.rsqrt(vi + _BN_EPS)
    e1r = (e1r_ref[...] - mr) * inv_r + br_
    rr = (rr_ref[...] - mr) * inv_r + br_
    e1i = (e1i_ref[...] - mi) * inv_i + bi_
    ri = (ri_ref[...] - mi) * inv_i + bi_
    a = e1r * rr - e1i * ri          # (TB, D)  -> multiplies Er^T
    b = e1r * ri + e1i * rr          # (TB, D)  -> multiplies Ei^T
    ab_sc[...] = jnp.concatenate([a, b], axis=1).astype(ab_sc.dtype)


def _lse_kernel(e1r_ref, e1i_ref, rr_ref, ri_ref, bn_ref, et_ref,
                lse_ref, ab_sc, m_sc, l_sc):
    """Pass 1: stream ET tiles, single K=2D MXU dot, online softmax -> lse."""
    j = pl.program_id(1)
    nj = pl.num_programs(1)

    @pl.when(j == 0)
    def _init():
        _fused_ab_into(e1r_ref, e1i_ref, rr_ref, ri_ref, bn_ref, ab_sc)
        m_sc[...] = jnp.full_like(m_sc, -jnp.inf)
        l_sc[...] = jnp.zeros_like(l_sc)

    # One fused bf16 matmul: (TB, 2D) @ (2D, TN) -> f32 (TB, TN), entity axis lane-dense.
    s = jnp.dot(ab_sc[...], et_ref[...], preferred_element_type=jnp.float32)

    # Online softmax statistics over the tiled entity axis.
    # NOTE: exp kept in f32 for v5e compatibility (no bf16 EUP there).
    m_prev = m_sc[...]
    m_new = jnp.maximum(m_prev, jnp.max(s, axis=1, keepdims=True))
    l_sc[...] = (l_sc[...] * jnp.exp(m_prev - m_new)
                 + jnp.sum(jnp.exp(s - m_new), axis=1, keepdims=True))
    m_sc[...] = m_new

    @pl.when(j == nj - 1)
    def _fin():
        lse_ref[...] = m_sc[...] + jnp.log(l_sc[...])


def _probs_bce_kernel(e1r_ref, e1i_ref, rr_ref, ri_ref, bn_ref, et_ref, lse_ref,
                      tgt_ref, probs_ref, bce_ref, ab_sc, acc_sc):
    """Pass 2: recompute scores (flash-style), logits = exp(s - lse), per-row BCE sums."""
    j = pl.program_id(1)
    nj = pl.num_programs(1)

    @pl.when(j == 0)
    def _init():
        _fused_ab_into(e1r_ref, e1i_ref, rr_ref, ri_ref, bn_ref, ab_sc)
        acc_sc[...] = jnp.zeros_like(acc_sc)

    s = jnp.dot(ab_sc[...], et_ref[...], preferred_element_type=jnp.float32)
    logp = s - lse_ref[...]                    # log-softmax directly, no log(probs) pass
    p = jnp.exp(logp)
    probs_ref[...] = p

    t = tgt_ref[...]
    # Match torch.nn.BCELoss: clamp log terms at -100.
    logp_c = jnp.maximum(logp, -100.0)
    log1mp = jnp.maximum(jnp.log(1.0 - p), -100.0)
    acc_sc[...] += jnp.sum(-(t * logp_c + (1.0 - t) * log1mp), axis=1, keepdims=True)

    @pl.when(j == nj - 1)
    def _fin():
        bce_ref[...] = acc_sc[...]             # unscaled per-row partial sums


def _vmem_bytes(TB, D, TN):
    """Rough double-buffered VMEM footprint (pass 2, the larger of the two passes)."""
    f32, bf16 = 4, 2
    two_d = 2 * D
    est = 0
    est += 2 * 4 * TB * D * f32      # e1r/e1i/rr/ri streams
    est += 2 * 8 * D * f32           # bn params
    est += 2 * two_d * TN * bf16     # concatenated table tile
    est += 2 * TB * f32              # lse
    est += 2 * TB * TN * f32         # targets in
    est += 2 * TB * TN * f32         # probs out
    est += 2 * TB * f32              # per-row bce out
    est += TB * two_d * bf16         # ab scratch
    est += 2 * TB * f32              # online-softmax / acc scratch
    return est


@functools.partial(jax.jit, static_argnames=("tile_n", "tile_b"))
def complexex_forward(e1_idx, rel_idx, targets, params, *, tile_n=1024, tile_b=128):
    Er, Ei, Rr, Ri = params["Er"], params["Ei"], params["Rr"], params["Ri"]
    ET, bn = params["ET"], params["bn"]

    # Embedding gathers (glue, plain JAX).
    e1r = Er[e1_idx]
    e1i = Ei[e1_idx]
    rr = Rr[rel_idx]
    ri = Ri[rel_idx]

    B, D = e1r.shape
    N = ET.shape[1]

    TB = min(tile_b, B)
    assert B % TB == 0, "batch must be a multiple of tile_b"
    # Entity tile: as large as the VMEM budget allows (big lane-dense tiles amortize
    # the ~0.35 us/step grid overhead and give unmasked vector stores).
    TN = min(tile_n, N)
    vmem_budget = 24 * 1024 * 1024
    while TN > 128 and _vmem_bytes(TB, D, TN) > vmem_budget:
        TN //= 2
    assert N % TN == 0, "num_entities must be a multiple of the chosen entity tile"
    nb, nj = B // TB, N // TN

    # Explicit scoped-VMEM limit with headroom; capped at 48 MiB (safe on v7x's 64 MiB).
    vmem_limit = int(min(max(_vmem_bytes(TB, D, TN) * 3 // 2, 8 << 20), 48 << 20))

    entity_spec = pl.BlockSpec((TB, D), lambda i, j: (i, 0))
    table_spec = pl.BlockSpec((2 * D, TN), lambda i, j: (0, j))
    bn_spec = pl.BlockSpec((8, D), lambda i, j: (0, 0))

    # ---- Pass 1: online softmax over streamed table tiles -> lse only (no score HBM). ----
    lse = pl.pallas_call(
        _lse_kernel,
        out_shape=jax.ShapeDtypeStruct((B, 1), jnp.float32),
        grid_spec=pltpu.PrefetchScalarGridSpec(
            num_scalar_prefetch=0,
            grid=(nb, nj),
            in_specs=[entity_spec, entity_spec, entity_spec, entity_spec,
                      bn_spec, table_spec],
            out_specs=pl.BlockSpec((TB, 1), lambda i, j: (i, 0)),
            scratch_shapes=[
                pltpu.VMEM((TB, 2 * D), jnp.bfloat16),   # fused [a | b] (bf16, cast once)
                pltpu.VMEM((TB, 1), jnp.float32),        # running max
                pltpu.VMEM((TB, 1), jnp.float32),        # running sum-exp
            ],
        ),
        compiler_params=pltpu.CompilerParams(
            dimension_semantics=("parallel", "arbitrary"),
            vmem_limit_bytes=vmem_limit),
    )(e1r, e1i, rr, ri, bn, ET)

    # ---- Pass 2: recompute scores, emit softmax logits + per-row BCE partial sums. ----
    probs, bce_rows = pl.pallas_call(
        _probs_bce_kernel,
        out_shape=(
            jax.ShapeDtypeStruct((B, N), jnp.float32),
            jax.ShapeDtypeStruct((B, 1), jnp.float32),
        ),
        grid_spec=pltpu.PrefetchScalarGridSpec(
            num_scalar_prefetch=0,
            grid=(nb, nj),
            in_specs=[entity_spec, entity_spec, entity_spec, entity_spec,
                      bn_spec, table_spec,
                      pl.BlockSpec((TB, 1), lambda i, j: (i, 0)),      # lse
                      pl.BlockSpec((TB, TN), lambda i, j: (i, j))],    # targets
            out_specs=(
                pl.BlockSpec((TB, TN), lambda i, j: (i, j)),           # softmax logits
                pl.BlockSpec((TB, 1), lambda i, j: (i, 0)),            # per-row BCE sums
            ),
            scratch_shapes=[
                pltpu.VMEM((TB, 2 * D), jnp.bfloat16),                 # fused [a | b]
                pltpu.VMEM((TB, 1), jnp.float32),                      # row BCE accumulator
            ],
        ),
        compiler_params=pltpu.CompilerParams(
            dimension_semantics=("parallel", "arbitrary"),
            vmem_limit_bytes=vmem_limit),
    )(e1r, e1i, rr, ri, bn, ET, lse, targets)

    # Scale once in JAX (avoids accumulating tiny increments into a growing scalar).
    loss = jnp.sum(bce_rows) / jnp.float32(B * N)
    return probs, loss


def init_params(key, num_entities, num_relations, embedding_dim):
    k1, k2, k3, k4, k5, k6 = jax.random.split(key, 6)
    # xavier_normal_ : std = sqrt(2 / (fan_in + fan_out))
    std_e = (2.0 / (num_entities + embedding_dim)) ** 0.5
    std_r = (2.0 / (num_relations + embedding_dim)) ** 0.5
    Er = std_e * jax.random.normal(k1, (num_entities, embedding_dim), jnp.float32)
    Ei = std_e * jax.random.normal(k2, (num_entities, embedding_dim), jnp.float32)
    Rr = std_r * jax.random.normal(k3, (num_relations, embedding_dim), jnp.float32)
    Ri = std_r * jax.random.normal(k4, (num_relations, embedding_dim), jnp.float32)
    # BatchNorm params (eval): rows = [g_r, b_r, mean_r, var_r, g_i, b_i, mean_i, var_i]
    gamma_r = 1.0 + 0.1 * jax.random.normal(k5, (embedding_dim,), jnp.float32)
    gamma_i = 1.0 + 0.1 * jax.random.normal(k6, (embedding_dim,), jnp.float32)
    bn = jnp.stack([
        gamma_r,
        jnp.zeros((embedding_dim,), jnp.float32),      # beta_r
        jnp.zeros((embedding_dim,), jnp.float32),      # running_mean_r
        jnp.ones((embedding_dim,), jnp.float32),       # running_var_r
        gamma_i,
        jnp.zeros((embedding_dim,), jnp.float32),      # beta_i
        jnp.zeros((embedding_dim,), jnp.float32),      # running_mean_i
        jnp.ones((embedding_dim,), jnp.float32),       # running_var_i
    ], axis=0)
    # Single concatenated, pre-transposed bf16 entity table for the fused K=2D MXU dot.
    ET = jnp.concatenate([Er.T, Ei.T], axis=0).astype(jnp.bfloat16)   # (2D, N)
    return {"Er": Er, "Ei": Ei, "Rr": Rr, "Ri": Ri, "ET": ET, "bn": bn}


def _reference(e1_idx, rel_idx, targets, params):
    """Pure-JAX eval-mode reference (f32 tables) for tolerance checking."""
    eps = 1e-5
    Er, Ei, Rr, Ri, bn = (params["Er"], params["Ei"], params["Rr"],
                          params["Ri"], params["bn"])

    def bn_apply(x, g, b, m, v):
        return (x - m) * g / jnp.sqrt(v + eps) + b

    e1r = bn_apply(Er[e1_idx], bn[0], bn[1], bn[2], bn[3])
    rr = bn_apply(Rr[rel_idx], bn[0], bn[1], bn[2], bn[3])
    e1i = bn_apply(Ei[e1_idx], bn[4], bn[5], bn[6], bn[7])
    ri = bn_apply(Ri[rel_idx], bn[4], bn[5], bn[6], bn[7])
    score = (e1r * rr - e1i * ri) @ Er.T + (e1r * ri + e1i * rr) @ Ei.T
    probs = jax.nn.softmax(score, axis=1)
    logp = jnp.maximum(jnp.log(probs), -100.0)
    log1mp = jnp.maximum(jnp.log(1.0 - probs), -100.0)
    loss = jnp.mean(-(targets * logp + (1.0 - targets) * log1mp))
    return probs, loss


if __name__ == "__main__":
    num_entities = 512
    num_relations = 16
    embedding_dim = 32
    batch = 8

    key = jax.random.PRNGKey(0)
    kp, ke, kr = jax.random.split(key, 3)
    params = init_params(kp, num_entities, num_relations, embedding_dim)

    e1_idx = jax.random.randint(ke, (batch,), 0, num_entities, dtype=jnp.int32)
    rel_idx = jax.random.randint(kr, (batch,), 0, num_relations, dtype=jnp.int32)
    # Dense targets in [0, 1] for BCE (one-hot here, but arbitrary is supported).
    tgt_ids = jax.random.randint(jax.random.PRNGKey(42), (batch,), 0,
                                 num_entities, dtype=jnp.int32)
    targets = jax.nn.one_hot(tgt_ids, num_entities, dtype=jnp.float32)

    logits, loss = complexex_forward(e1_idx, rel_idx, targets, params)
    jax.block_until_ready((logits, loss))

    assert logits.shape == (batch, num_entities)
    assert bool(jnp.isfinite(loss))
    # Rows of the softmax sum to 1.
    assert jnp.allclose(jnp.sum(logits, axis=1), 1.0, atol=1e-4)
    # Tolerance check against a pure-JAX f32 reference (bf16 table matmul perturbs slightly).
    ref_logits, ref_loss = _reference(e1_idx, rel_idx, targets, params)
    assert jnp.allclose(logits, ref_logits, atol=5e-4, rtol=5e-2)
    assert jnp.allclose(loss, ref_loss, rtol=5e-2, atol=1e-4)
    print("KERNEL_OK")
</pallas_src>

<mosaic_0001>
module attributes {stable_mosaic.version = 11 : i64} {
  func.func @_lse_kernel(%arg0: i32, %arg1: i32, %arg2: memref<8x32xf32, #tpu.memory_space<vmem>>, %arg3: memref<8x32xf32, #tpu.memory_space<vmem>>, %arg4: memref<8x32xf32, #tpu.memory_space<vmem>>, %arg5: memref<8x32xf32, #tpu.memory_space<vmem>>, %arg6: memref<8x32xf32, #tpu.memory_space<vmem>>, %arg7: memref<64x512xbf16, #tpu.memory_space<vmem>>, %arg8: memref<8x1xf32, #tpu.memory_space<vmem>>, %arg9: memref<8x64xbf16, #tpu.memory_space<vmem>>, %arg10: memref<8x1xf32, #tpu.memory_space<vmem>>, %arg11: memref<8x1xf32, #tpu.memory_space<vmem>>) attributes {dimension_semantics = [#tpu.dimension_semantics<parallel>, #tpu.dimension_semantics<arbitrary>], iteration_bounds = array<i64: 1, 1>, scalar_prefetch = 0 : i64, scratch_operands = 3 : i64, tpu.core_type = #tpu.core_type<tc>, window_params = [{transform_indices = @transform_0, window_bounds = array<i64: 8, 32>}, {transform_indices = @transform_1, window_bounds = array<i64: 8, 32>}, {transform_indices = @transform_2, window_bounds = array<i64: 8, 32>}, {transform_indices = @transform_3, window_bounds = array<i64: 8, 32>}, {pipeline_mode = #tpu.pipeline_mode<synchronous>, transform_indices = @transform_4, window_bounds = array<i64: 8, 32>}, {transform_indices = @transform_5, window_bounds = array<i64: 64, 512>}, {transform_indices = @transform_6, window_bounds = array<i64: 8, 1>}]} {
    %c0_i32 = arith.constant 0 : i32
    %0 = arith.cmpi eq, %arg1, %c0_i32 : i32
    %1 = arith.extui %0 : i1 to i32
    %c0_i32_0 = arith.constant 0 : i32
    %2 = arith.cmpi ne, %1, %c0_i32_0 : i32
    scf.if %2 {
      %c0_16 = arith.constant 0 : index
      %c0_17 = arith.constant 0 : index
      %25 = vector.load %arg6[%c0_16, %c0_17] : memref<8x32xf32, #tpu.memory_space<vmem>>, vector<1x32xf32>
      %c1 = arith.constant 1 : index
      %c0_18 = arith.constant 0 : index
      %26 = vector.load %arg6[%c1, %c0_18] : memref<8x32xf32, #tpu.memory_space<vmem>>, vector<1x32xf32>
      %c2 = arith.constant 2 : index
      %c0_19 = arith.constant 0 : index
      %27 = vector.load %arg6[%c2, %c0_19] : memref<8x32xf32, #tpu.memory_space<vmem>>, vector<1x32xf32>
      %c3 = arith.constant 3 : index
      %c0_20 = arith.constant 0 : index
      %28 = vector.load %arg6[%c3, %c0_20] : memref<8x32xf32, #tpu.memory_space<vmem>>, vector<1x32xf32>
      %c4 = arith.constant 4 : index
      %c0_21 = arith.constant 0 : index
      %29 = vector.load %arg6[%c4, %c0_21] : memref<8x32xf32, #tpu.memory_space<vmem>>, vector<1x32xf32>
      %c5 = arith.constant 5 : index
      %c0_22 = arith.constant 0 : index
      %30 = vector.load %arg6[%c5, %c0_22] : memref<8x32xf32, #tpu.memory_space<vmem>>, vector<1x32xf32>
      %c6 = arith.constant 6 : index
      %c0_23 = arith.constant 0 : index
      %31 = vector.load %arg6[%c6, %c0_23] : memref<8x32xf32, #tpu.memory_space<vmem>>, vector<1x32xf32>
      %c7 = arith.constant 7 : index
      %c0_24 = arith.constant 0 : index
      %32 = vector.load %arg6[%c7, %c0_24] : memref<8x32xf32, #tpu.memory_space<vmem>>, vector<1x32xf32>
      %cst_25 = arith.constant 9.99999974E-6 : f32
      %33 = vector.broadcast %cst_25 : f32 to vector<1x32xf32>
      %34 = arith.addf %28, %33 : vector<1x32xf32>
      %35 = math.rsqrt %34 : vector<1x32xf32>
      %36 = arith.mulf %25, %35 : vector<1x32xf32>
      %cst_26 = arith.constant 9.99999974E-6 : f32
      %37 = vector.broadcast %cst_26 : f32 to vector<1x32xf32>
      %38 = arith.addf %32, %37 : vector<1x32xf32>
      %39 = math.rsqrt %38 : vector<1x32xf32>
      %40 = arith.mulf %29, %39 : vector<1x32xf32>
      %c0_27 = arith.constant 0 : index
      %c0_28 = arith.constant 0 : index
      %41 = vector.load %arg2[%c0_27, %c0_28] : memref<8x32xf32, #tpu.memory_space<vmem>>, vector<8x32xf32>
      %42 = vector.broadcast %27 : vector<1x32xf32> to vector<8x32xf32>
      %43 = arith.subf %41, %42 : vector<8x32xf32>
      %44 = vector.broadcast %36 : vector<1x32xf32> to vector<8x32xf32>
      %45 = arith.mulf %43, %44 : vector<8x32xf32>
      %46 = vector.broadcast %26 : vector<1x32xf32> to vector<8x32xf32>
      %47 = arith.addf %45, %46 : vector<8x32xf32>
      %c0_29 = arith.constant 0 : index
      %c0_30 = arith.constant 0 : index
      %48 = vector.load %arg4[%c0_29, %c0_30] : memref<8x32xf32, #tpu.memory_space<vmem>>, vector<8x32xf32>
      %49 = vector.broadcast %27 : vector<1x32xf32> to vector<8x32xf32>
      %50 = arith.subf %48, %49 : vector<8x32xf32>
      %51 = vector.broadcast %36 : vector<1x32xf32> to vector<8x32xf32>
      %52 = arith.mulf %50, %51 : vector<8x32xf32>
      %53 = vector.broadcast %26 : vector<1x32xf32> to vector<8x32xf32>
      %54 = arith.addf %52, %53 : vector<8x32xf32>
      %c0_31 = arith.constant 0 : index
      %c0_32 = arith.constant 0 : index
      %55 = vector.load %arg3[%c0_31, %c0_32] : memref<8x32xf32, #tpu.memory_space<vmem>>, vector<8x32xf32>
      %56 = vector.broadcast %31 : vector<1x32xf32> to vector<8x32xf32>
      %57 = arith.subf %55, %56 : vector<8x32xf32>
      %58 = vector.broadcast %40 : vector<1x32xf32> to vector<8x32xf32>
      %59 = arith.mulf %57, %58 : vector<8x32xf32>
      %60 = vector.broadcast %30 : vector<1x32xf32> to vector<8x32xf32>
      %61 = arith.addf %59, %60 : vector<8x32xf32>
      %c0_33 = arith.constant 0 : index
      %c0_34 = arith.constant 0 : index
      %62 = vector.load %arg5[%c0_33, %c0_34] : memref<8x32xf32, #tpu.memory_space<vmem>>, vector<8x32xf32>
      %63 = vector.broadcast %31 : vector<1x32xf32> to vector<8x32xf32>
      %64 = arith.subf %62, %63 : vector<8x32xf32>
      %65 = vector.broadcast %40 : vector<1x32xf32> to vector<8x32xf32>
      %66 = arith.mulf %64, %65 : vector<8x32xf32>
      %67 = vector.broadcast %30 : vector<1x32xf32> to vector<8x32xf32>
      %68 = arith.addf %66, %67 : vector<8x32xf32>
      %69 = arith.mulf %47, %54 : vector<8x32xf32>
      %70 = arith.mulf %61, %68 : vector<8x32xf32>
      %71 = arith.subf %69, %70 : vector<8x32xf32>
      %72 = arith.mulf %47, %68 : vector<8x32xf32>
      %73 = arith.mulf %61, %54 : vector<8x32xf32>
      %74 = arith.addf %72, %73 : vector<8x32xf32>
      %75 = tpu.concatenate %71, %74 in 1 : vector<8x32xf32>, vector<8x32xf32> -> vector<8x64xf32>
      %76 = arith.truncf %75 : vector<8x64xf32> to vector<8x64xbf16>
      %c0_35 = arith.constant 0 : index
      %c0_36 = arith.constant 0 : index
      %77 = vector.load %arg9[%c0_35, %c0_36] : memref<8x64xbf16, #tpu.memory_space<vmem>>, vector<8x64xbf16>
      tpu.vector_store %arg9[%c0_35, %c0_36], %76 {strides = array<i32>} : memref<8x64xbf16, #tpu.memory_space<vmem>>, vector<8x64xbf16>,
      %cst_37 = arith.constant 0xFF800000 : f32
      %78 = vector.broadcast %cst_37 : f32 to vector<8x1xf32>
      %c0_38 = arith.constant 0 : index
      %c0_39 = arith.constant 0 : index
      %79 = vector.load %arg10[%c0_38, %c0_39] : memref<8x1xf32, #tpu.memory_space<vmem>>, vector<8x1xf32>
      tpu.vector_store %arg10[%c0_38, %c0_39], %78 {strides = array<i32>} : memref<8x1xf32, #tpu.memory_space<vmem>>, vector<8x1xf32>,
      %cst_40 = arith.constant 0.000000e+00 : f32
      %80 = vector.broadcast %cst_40 : f32 to vector<8x1xf32>
      %c0_41 = arith.constant 0 : index
      %c0_42 = arith.constant 0 : index
      %81 = vector.load %arg11[%c0_41, %c0_42] : memref<8x1xf32, #tpu.memory_space<vmem>>, vector<8x1xf32>
      tpu.vector_store %arg11[%c0_41, %c0_42], %80 {strides = array<i32>} : memref<8x1xf32, #tpu.memory_space<vmem>>, vector<8x1xf32>,
    } else {
    }
    %c0 = arith.constant 0 : index
    %c0_1 = arith.constant 0 : index
    %3 = vector.load %arg9[%c0, %c0_1] : memref<8x64xbf16, #tpu.memory_space<vmem>>, vector<8x64xbf16>
    %c0_2 = arith.constant 0 : index
    %c0_3 = arith.constant 0 : index
    %4 = vector.load %arg7[%c0_2, %c0_3] : memref<64x512xbf16, #tpu.memory_space<vmem>>, vector<64x512xbf16>
    %cst = arith.constant dense<0.000000e+00> : vector<8x512xf32>
    %5 = tpu.matmul %3, %4, %cst {dimension_numbers = #tpu.dot_dimension_numbers<[1], [0], [0], [1], [0, 0, 1, 1], [], []>} : vector<8x64xbf16>, vector<64x512xbf16>, vector<8x512xf32> -> vector<8x512xf32>
    %c0_4 = arith.constant 0 : index
    %c0_5 = arith.constant 0 : index
    %6 = vector.load %arg10[%c0_4, %c0_5] : memref<8x1xf32, #tpu.memory_space<vmem>>, vector<8x1xf32>
    %cst_6 = arith.constant dense<0xFF800000> : vector<8xf32>
    %7 = vector.multi_reduction <maximumf>, %5, %cst_6 [1] : vector<8x512xf32> to vector<8xf32>
    %8 = vector.shape_cast %7 : vector<8xf32> to vector<8x1xf32>
    %9 = arith.maximumf %6, %8 : vector<8x1xf32>
    %c0_7 = arith.constant 0 : index
    %c0_8 = arith.constant 0 : index
    %10 = vector.load %arg11[%c0_7, %c0_8] : memref<8x1xf32, #tpu.memory_space<vmem>>, vector<8x1xf32>
    %11 = arith.subf %6, %9 : vector<8x1xf32>
    %12 = math.exp %11 : vector<8x1xf32>
    %13 = arith.mulf %10, %12 : vector<8x1xf32>
    %14 = vector.broadcast %9 : vector<8x1xf32> to vector<8x512xf32>
    %15 = arith.subf %5, %14 : vector<8x512xf32>
    %16 = math.exp %15 : vector<8x512xf32>
    %cst_9 = arith.constant dense<0.000000e+00> : vector<8xf32>
    %17 = vector.multi_reduction <add>, %16, %cst_9 [1] : vector<8x512xf32> to vector<8xf32>
    %18 = vector.shape_cast %17 : vector<8xf32> to vector<8x1xf32>
    %19 = arith.addf %13, %18 : vector<8x1xf32>
    %c0_10 = arith.constant 0 : index
    %c0_11 = arith.constant 0 : index
    %20 = vector.load %arg11[%c0_10, %c0_11] : memref<8x1xf32, #tpu.memory_space<vmem>>, vector<8x1xf32>
    tpu.vector_store %arg11[%c0_10, %c0_11], %19 {strides = array<i32>} : memref<8x1xf32, #tpu.memory_space<vmem>>, vector<8x1xf32>,
    %c0_12 = arith.constant 0 : index
    %c0_13 = arith.constant 0 : index
    %21 = vector.load %arg10[%c0_12, %c0_13] : memref<8x1xf32, #tpu.memory_space<vmem>>, vector<8x1xf32>
    tpu.vector_store %arg10[%c0_12, %c0_13], %9 {strides = array<i32>} : memref<8x1xf32, #tpu.memory_space<vmem>>, vector<8x1xf32>,
    %c0_i32_14 = arith.constant 0 : i32
    %22 = arith.cmpi eq, %arg1, %c0_i32_14 : i32
    %23 = arith.extui %22 : i1 to i32
    %c0_i32_15 = arith.constant 0 : i32
    %24 = arith.cmpi ne, %23, %c0_i32_15 : i32
    scf.if %24 {
      %c0_16 = arith.constant 0 : index
      %c0_17 = arith.constant 0 : index
      %25 = vector.load %arg10[%c0_16, %c0_17] : memref<8x1xf32, #tpu.memory_space<vmem>>, vector<8x1xf32>
      %c0_18 = arith.constant 0 : index
      %c0_19 = arith.constant 0 : index
      %26 = vector.load %arg11[%c0_18, %c0_19] : memref<8x1xf32, #tpu.memory_space<vmem>>, vector<8x1xf32>
      %27 = math.log %26 : vector<8x1xf32>
      %28 = arith.addf %25, %27 : vector<8x1xf32>
      %c0_20 = arith.constant 0 : index
      %c0_21 = arith.constant 0 : index
      %29 = vector.load %arg8[%c0_20, %c0_21] : memref<8x1xf32, #tpu.memory_space<vmem>>, vector<8x1xf32>
      tpu.vector_store %arg8[%c0_20, %c0_21], %28 {strides = array<i32>} : memref<8x1xf32, #tpu.memory_space<vmem>>, vector<8x1xf32>,
    } else {
    }
    return
  }
  func.func @transform_0(%arg0: i32, %arg1: i32) -> (i32, i32) {
    %c0_i32 = arith.constant 0 : i32
    %c0_i32_0 = arith.constant 0 : i32
    return %arg0, %c0_i32 : i32, i32
  }
  func.func @transform_1(%arg0: i32, %arg1: i32) -> (i32, i32) {
    %c0_i32 = arith.constant 0 : i32
    %c0_i32_0 = arith.constant 0 : i32
    return %arg0, %c0_i32 : i32, i32
  }
  func.func @transform_2(%arg0: i32, %arg1: i32) -> (i32, i32) {
    %c0_i32 = arith.constant 0 : i32
    %c0_i32_0 = arith.constant 0 : i32
    return %arg0, %c0_i32 : i32, i32
  }
  func.func @transform_3(%arg0: i32, %arg1: i32) -> (i32, i32) {
    %c0_i32 = arith.constant 0 : i32
    %c0_i32_0 = arith.constant 0 : i32
    return %arg0, %c0_i32 : i32, i32
  }
  func.func @transform_4(%arg0: i32, %arg1: i32) -> (i32, i32) {
    %c0_i32 = arith.constant 0 : i32
    %c0_i32_0 = arith.constant 0 : i32
    %c0_i32_1 = arith.constant 0 : i32
    return %c0_i32, %c0_i32_0 : i32, i32
  }
  func.func @transform_5(%arg0: i32, %arg1: i32) -> (i32, i32) {
    %c0_i32 = arith.constant 0 : i32
    %c0_i32_0 = arith.constant 0 : i32
    return %c0_i32, %arg1 : i32, i32
  }
  func.func @transform_6(%arg0: i32, %arg1: i32) -> (i32, i32) {
    %c0_i32 = arith.constant 0 : i32
    %c0_i32_0 = arith.constant 0 : i32
    return %arg0, %c0_i32 : i32, i32
  }
}

module attributes {stable_mosaic.version = 11 : i64} {
  func.func @_probs_bce_kernel(%arg0: i32, %arg1: i32, %arg2: memref<8x32xf32, #tpu.memory_space<vmem>>, %arg3: memref<8x32xf32, #tpu.memory_space<vmem>>, %arg4: memref<8x32xf32, #tpu.memory_space<vmem>>, %arg5: memref<8x32xf32, #tpu.memory_space<vmem>>, %arg6: memref<8x32xf32, #tpu.memory_space<vmem>>, %arg7: memref<64x512xbf16, #tpu.memory_space<vmem>>, %arg8: memref<8x1xf32, #tpu.memory_space<vmem>>, %arg9: memref<8x512xf32, #tpu.memory_space<vmem>>, %arg10: memref<8x512xf32, #tpu.memory_space<vmem>>, %arg11: memref<8x1xf32, #tpu.memory_space<vmem>>, %arg12: memref<8x64xbf16, #tpu.memory_space<vmem>>, %arg13: memref<8x1xf32, #tpu.memory_space<vmem>>) attributes {dimension_semantics = [#tpu.dimension_semantics<parallel>, #tpu.dimension_semantics<arbitrary>], iteration_bounds = array<i64: 1, 1>, scalar_prefetch = 0 : i64, scratch_operands = 2 : i64, tpu.core_type = #tpu.core_type<tc>, window_params = [{transform_indices = @transform_0, window_bounds = array<i64: 8, 32>}, {transform_indices = @transform_1, window_bounds = array<i64: 8, 32>}, {transform_indices = @transform_2, window_bounds = array<i64: 8, 32>}, {transform_indices = @transform_3, window_bounds = array<i64: 8, 32>}, {pipeline_mode = #tpu.pipeline_mode<synchronous>, transform_indices = @transform_4, window_bounds = array<i64: 8, 32>}, {transform_indices = @transform_5, window_bounds = array<i64: 64, 512>}, {transform_indices = @transform_6, window_bounds = array<i64: 8, 1>}, {transform_indices = @transform_7, window_bounds = array<i64: 8, 512>}, {transform_indices = @transform_8, window_bounds = array<i64: 8, 512>}, {transform_indices = @transform_9, window_bounds = array<i64: 8, 1>}]} {
    %c0_i32 = arith.constant 0 : i32
    %0 = arith.cmpi eq, %arg1, %c0_i32 : i32
    %1 = arith.extui %0 : i1 to i32
    %c0_i32_0 = arith.constant 0 : i32
    %2 = arith.cmpi ne, %1, %c0_i32_0 : i32
    scf.if %2 {
      %c0_22 = arith.constant 0 : index
      %c0_23 = arith.constant 0 : index
      %34 = vector.load %arg6[%c0_22, %c0_23] : memref<8x32xf32, #tpu.memory_space<vmem>>, vector<1x32xf32>
      %c1 = arith.constant 1 : index
      %c0_24 = arith.constant 0 : index
      %35 = vector.load %arg6[%c1, %c0_24] : memref<8x32xf32, #tpu.memory_space<vmem>>, vector<1x32xf32>
      %c2 = arith.constant 2 : index
      %c0_25 = arith.constant 0 : index
      %36 = vector.load %arg6[%c2, %c0_25] : memref<8x32xf32, #tpu.memory_space<vmem>>, vector<1x32xf32>
      %c3 = arith.constant 3 : index
      %c0_26 = arith.constant 0 : index
      %37 = vector.load %arg6[%c3, %c0_26] : memref<8x32xf32, #tpu.memory_space<vmem>>, vector<1x32xf32>
      %c4 = arith.constant 4 : index
      %c0_27 = arith.constant 0 : index
      %38 = vector.load %arg6[%c4, %c0_27] : memref<8x32xf32, #tpu.memory_space<vmem>>, vector<1x32xf32>
      %c5 = arith.constant 5 : index
      %c0_28 = arith.constant 0 : index
      %39 = vector.load %arg6[%c5, %c0_28] : memref<8x32xf32, #tpu.memory_space<vmem>>, vector<1x32xf32>
      %c6 = arith.constant 6 : index
      %c0_29 = arith.constant 0 : index
      %40 = vector.load %arg6[%c6, %c0_29] : memref<8x32xf32, #tpu.memory_space<vmem>>, vector<1x32xf32>
      %c7 = arith.constant 7 : index
      %c0_30 = arith.constant 0 : index
      %41 = vector.load %arg6[%c7, %c0_30] : memref<8x32xf32, #tpu.memory_space<vmem>>, vector<1x32xf32>
      %cst_31 = arith.constant 9.99999974E-6 : f32
      %42 = vector.broadcast %cst_31 : f32 to vector<1x32xf32>
      %43 = arith.addf %37, %42 : vector<1x32xf32>
      %44 = math.rsqrt %43 : vector<1x32xf32>
      %45 = arith.mulf %34, %44 : vector<1x32xf32>
      %cst_32 = arith.constant 9.99999974E-6 : f32
      %46 = vector.broadcast %cst_32 : f32 to vector<1x32xf32>
      %47 = arith.addf %41, %46 : vector<1x32xf32>
      %48 = math.rsqrt %47 : vector<1x32xf32>
      %49 = arith.mulf %38, %48 : vector<1x32xf32>
      %c0_33 = arith.constant 0 : index
      %c0_34 = arith.constant 0 : index
      %50 = vector.load %arg2[%c0_33, %c0_34] : memref<8x32xf32, #tpu.memory_space<vmem>>, vector<8x32xf32>
      %51 = vector.broadcast %36 : vector<1x32xf32> to vector<8x32xf32>
      %52 = arith.subf %50, %51 : vector<8x32xf32>
      %53 = vector.broadcast %45 : vector<1x32xf32> to vector<8x32xf32>
      %54 = arith.mulf %52, %53 : vector<8x32xf32>
      %55 = vector.broadcast %35 : vector<1x32xf32> to vector<8x32xf32>
      %56 = arith.addf %54, %55 : vector<8x32xf32>
      %c0_35 = arith.constant 0 : index
      %c0_36 = arith.constant 0 : index
      %57 = vector.load %arg4[%c0_35, %c0_36] : memref<8x32xf32, #tpu.memory_space<vmem>>, vector<8x32xf32>
      %58 = vector.broadcast %36 : vector<1x32xf32> to vector<8x32xf32>
      %59 = arith.subf %57, %58 : vector<8x32xf32>
      %60 = vector.broadcast %45 : vector<1x32xf32> to vector<8x32xf32>
      %61 = arith.mulf %59, %60 : vector<8x32xf32>
      %62 = vector.broadcast %35 : vector<1x32xf32> to vector<8x32xf32>
      %63 = arith.addf %61, %62 : vector<8x32xf32>
      %c0_37 = arith.constant 0 : index
      %c0_38 = arith.constant 0 : index
      %64 = vector.load %arg3[%c0_37, %c0_38] : memref<8x32xf32, #tpu.memory_space<vmem>>, vector<8x32xf32>
      %65 = vector.broadcast %40 : vector<1x32xf32> to vector<8x32xf32>
      %66 = arith.subf %64, %65 : vector<8x32xf32>
      %67 = vector.broadcast %49 : vector<1x32xf32> to vector<8x32xf32>
      %68 = arith.mulf %66, %67 : vector<8x32xf32>
      %69 = vector.broadcast %39 : vector<1x32xf32> to vector<8x32xf32>
      %70 = arith.addf %68, %69 : vector<8x32xf32>
      %c0_39 = arith.constant 0 : index
      %c0_40 = arith.constant 0 : index
      %71 = vector.load %arg5[%c0_39, %c0_40] : memref<8x32xf32, #tpu.memory_space<vmem>>, vector<8x32xf32>
      %72 = vector.broadcast %40 : vector<1x32xf32> to vector<8x32xf32>
      %73 = arith.subf %71, %72 : vector<8x32xf32>
      %74 = vector.broadcast %49 : vector<1x32xf32> to vector<8x32xf32>
      %75 = arith.mulf %73, %74 : vector<8x32xf32>
      %76 = vector.broadcast %39 : vector<1x32xf32> to vector<8x32xf32>
      %77 = arith.addf %75, %76 : vector<8x32xf32>
      %78 = arith.mulf %56, %63 : vector<8x32xf32>
      %79 = arith.mulf %70, %77 : vector<8x32xf32>
      %80 = arith.subf %78, %79 : vector<8x32xf32>
      %81 = arith.mulf %56, %77 : vector<8x32xf32>
      %82 = arith.mulf %70, %63 : vector<8x32xf32>
      %83 = arith.addf %81, %82 : vector<8x32xf32>
      %84 = tpu.concatenate %80, %83 in 1 : vector<8x32xf32>, vector<8x32xf32> -> vector<8x64xf32>
      %85 = arith.truncf %84 : vector<8x64xf32> to vector<8x64xbf16>
      %c0_41 = arith.constant 0 : index
      %c0_42 = arith.constant 0 : index
      %86 = vector.load %arg12[%c0_41, %c0_42] : memref<8x64xbf16, #tpu.memory_space<vmem>>, vector<8x64xbf16>
      tpu.vector_store %arg12[%c0_41, %c0_42], %85 {strides = array<i32>} : memref<8x64xbf16, #tpu.memory_space<vmem>>, vector<8x64xbf16>,
      %cst_43 = arith.constant 0.000000e+00 : f32
      %87 = vector.broadcast %cst_43 : f32 to vector<8x1xf32>
      %c0_44 = arith.constant 0 : index
      %c0_45 = arith.constant 0 : index
      %88 = vector.load %arg13[%c0_44, %c0_45] : memref<8x1xf32, #tpu.memory_space<vmem>>, vector<8x1xf32>
      tpu.vector_store %arg13[%c0_44, %c0_45], %87 {strides = array<i32>} : memref<8x1xf32, #tpu.memory_space<vmem>>, vector<8x1xf32>,
    } else {
    }
    %c0 = arith.constant 0 : index
    %c0_1 = arith.constant 0 : index
    %3 = vector.load %arg12[%c0, %c0_1] : memref<8x64xbf16, #tpu.memory_space<vmem>>, vector<8x64xbf16>
    %c0_2 = arith.constant 0 : index
    %c0_3 = arith.constant 0 : index
    %4 = vector.load %arg7[%c0_2, %c0_3] : memref<64x512xbf16, #tpu.memory_space<vmem>>, vector<64x512xbf16>
    %cst = arith.constant dense<0.000000e+00> : vector<8x512xf32>
    %5 = tpu.matmul %3, %4, %cst {dimension_numbers = #tpu.dot_dimension_numbers<[1], [0], [0], [1], [0, 0, 1, 1], [], []>} : vector<8x64xbf16>, vector<64x512xbf16>, vector<8x512xf32> -> vector<8x512xf32>
    %c0_4 = arith.constant 0 : index
    %c0_5 = arith.constant 0 : index
    %6 = vector.load %arg8[%c0_4, %c0_5] : memref<8x1xf32, #tpu.memory_space<vmem>>, vector<8x1xf32>
    %7 = vector.broadcast %6 : vector<8x1xf32> to vector<8x512xf32>
    %8 = arith.subf %5, %7 : vector<8x512xf32>
    %9 = math.exp %8 : vector<8x512xf32>
    %c0_6 = arith.constant 0 : index
    %c0_7 = arith.constant 0 : index
    %10 = vector.load %arg10[%c0_6, %c0_7] : memref<8x512xf32, #tpu.memory_space<vmem>>, vector<8x512xf32>
    tpu.vector_store %arg10[%c0_6, %c0_7], %9 {strides = array<i32>} : memref<8x512xf32, #tpu.memory_space<vmem>>, vector<8x512xf32>,
    %c0_8 = arith.constant 0 : index
    %c0_9 = arith.constant 0 : index
    %11 = vector.load %arg9[%c0_8, %c0_9] : memref<8x512xf32, #tpu.memory_space<vmem>>, vector<8x512xf32>
    %cst_10 = arith.constant -1.000000e+02 : f32
    %12 = vector.broadcast %cst_10 : f32 to vector<8x512xf32>
    %13 = arith.maximumf %8, %12 : vector<8x512xf32>
    %cst_11 = arith.constant 1.000000e+00 : f32
    %14 = vector.broadcast %cst_11 : f32 to vector<8x512xf32>
    %15 = arith.subf %14, %9 : vector<8x512xf32>
    %16 = math.log %15 : vector<8x512xf32>
    %cst_12 = arith.constant -1.000000e+02 : f32
    %17 = vector.broadcast %cst_12 : f32 to vector<8x512xf32>
    %18 = arith.maximumf %16, %17 : vector<8x512xf32>
    %c0_13 = arith.constant 0 : index
    %c0_14 = arith.constant 0 : index
    %19 = vector.load %arg13[%c0_13, %c0_14] : memref<8x1xf32, #tpu.memory_space<vmem>>, vector<8x1xf32>
    %20 = arith.mulf %11, %13 : vector<8x512xf32>
    %cst_15 = arith.constant 1.000000e+00 : f32
    %21 = vector.broadcast %cst_15 : f32 to vector<8x512xf32>
    %22 = arith.subf %21, %11 : vector<8x512xf32>
    %23 = arith.mulf %22, %18 : vector<8x512xf32>
    %24 = arith.addf %20, %23 : vector<8x512xf32>
    %cst_16 = arith.constant 0.000000e+00 : f32
    %25 = vector.broadcast %cst_16 : f32 to vector<8x512xf32>
    %26 = arith.subf %25, %24 : vector<8x512xf32>
    %cst_17 = arith.constant dense<0.000000e+00> : vector<8xf32>
    %27 = vector.multi_reduction <add>, %26, %cst_17 [1] : vector<8x512xf32> to vector<8xf32>
    %28 = vector.shape_cast %27 : vector<8xf32> to vector<8x1xf32>
    %29 = arith.addf %19, %28 : vector<8x1xf32>
    %c0_18 = arith.constant 0 : index
    %c0_19 = arith.constant 0 : index
    %30 = vector.load %arg13[%c0_18, %c0_19] : memref<8x1xf32, #tpu.memory_space<vmem>>, vector<8x1xf32>
    tpu.vector_store %arg13[%c0_18, %c0_19], %29 {strides = array<i32>} : memref<8x1xf32, #tpu.memory_space<vmem>>, vector<8x1xf32>,
    %c0_i32_20 = arith.constant 0 : i32
    %31 = arith.cmpi eq, %arg1, %c0_i32_20 : i32
    %32 = arith.extui %31 : i1 to i32
    %c0_i32_21 = arith.constant 0 : i32
    %33 = arith.cmpi ne, %32, %c0_i32_21 : i32
    scf.if %33 {
      %c0_22 = arith.constant 0 : index
      %c0_23 = arith.constant 0 : index
      %34 = vector.load %arg13[%c0_22, %c0_23] : memref<8x1xf32, #tpu.memory_space<vmem>>, vector<8x1xf32>
      %c0_24 = arith.constant 0 : index
      %c0_25 = arith.constant 0 : index
      %35 = vector.load %arg11[%c0_24, %c0_25] : memref<8x1xf32, #tpu.memory_space<vmem>>, vector<8x1xf32>
      tpu.vector_store %arg11[%c0_24, %c0_25], %34 {strides = array<i32>} : memref<8x1xf32, #tpu.memory_space<vmem>>, vector<8x1xf32>,
    } else {
    }
    return
  }
  func.func @transform_0(%arg0: i32, %arg1: i32) -> (i32, i32) {
    %c0_i32 = arith.constant 0 : i32
    %c0_i32_0 = arith.constant 0 : i32
    return %arg0, %c0_i32 : i32, i32
  }
  func.func @transform_1(%arg0: i32, %arg1: i32) -> (i32, i32) {
    %c0_i32 = arith.constant 0 : i32
    %c0_i32_0 = arith.constant 0 : i32
    return %arg0, %c0_i32 : i32, i32
  }
  func.func @transform_2(%arg0: i32, %arg1: i32) -> (i32, i32) {
    %c0_i32 = arith.constant 0 : i32
    %c0_i32_0 = arith.constant 0 : i32
    return %arg0, %c0_i32 : i32, i32
  }
  func.func @transform_3(%arg0: i32, %arg1: i32) -> (i32, i32) {
    %c0_i32 = arith.constant 0 : i32
    %c0_i32_0 = arith.constant 0 : i32
    return %arg0, %c0_i32 : i32, i32
  }
  func.func @transform_4(%arg0: i32, %arg1: i32) -> (i32, i32) {
    %c0_i32 = arith.constant 0 : i32
    %c0_i32_0 = arith.constant 0 : i32
    %c0_i32_1 = arith.constant 0 : i32
    return %c0_i32, %c0_i32_0 : i32, i32
  }
  func.func @transform_5(%arg0: i32, %arg1: i32) -> (i32, i32) {
    %c0_i32 = arith.constant 0 : i32
    %c0_i32_0 = arith.constant 0 : i32
    return %c0_i32, %arg1 : i32, i32
  }
  func.func @transform_6(%arg0: i32, %arg1: i32) -> (i32, i32) {
    %c0_i32 = arith.constant 0 : i32
    %c0_i32_0 = arith.constant 0 : i32
    return %arg0, %c0_i32 : i32, i32
  }
  func.func @transform_7(%arg0: i32, %arg1: i32) -> (i32, i32) {
    %c0_i32 = arith.constant 0 : i32
    return %arg0, %arg1 : i32, i32
  }
  func.func @transform_8(%arg0: i32, %arg1: i32) -> (i32, i32) {
    %c0_i32 = arith.constant 0 : i32
    return %arg0, %arg1 : i32, i32
  }
  func.func @transform_9(%arg0: i32, %arg1: i32) -> (i32, i32) {
    %c0_i32 = arith.constant 0 : i32
    %c0_i32_0 = arith.constant 0 : i32
    return %arg0, %c0_i32 : i32, i32
  }
}

</mosaic_0001>

<bundles_post_ra>
// kernel: complexex_forward.3
= control target key start
LH: loop header
LB: loop body
LE: loop exit
PB: predicated region body
PF: predicated region fallthrough
CT: control target
= control target key end

     0   :  { %s720_s0 = inlined_call_operand.vmem [shape: f32[8,32], index: 0, kind: input, shape index: {}]   ;;  %s721_s1 = inlined_call_operand.vmem [shape: f32[8,32], index: 1, kind: input, shape index: {}]   ;;  %s722_s2 = inlined_call_operand.vmem [shape: f32[8,32], index: 2, kind: input, shape index: {}]   ;;  %s723_s3 = inlined_call_operand.vmem [shape: f32[8,32], index: 3, kind: input, shape index: {}]   ;;  %s724_s4 = inlined_call_operand.vmem [shape: f32[8,32], index: 4, kind: input, shape index: {}]   ;;  %s725_s5 = inlined_call_operand.vmem [shape: bf16[64,512], index: 5, kind: input, shape index: {}]   ;;  %s726_s6 = inlined_call_operand.vmem [shape: f32[8,1], index: 6, kind: input, shape index: {}]   ;;  %s727_s7 = inlined_call_operand.vmem [shape: f32[8,512], index: 7, kind: input, shape index: {}]   ;;  %s728_s8 = inlined_call_operand.hbm [shape: f32[8,512], index: 8, kind: output, shape index: {0}]   ;;  %s729_s9 = inlined_call_operand.vmem [shape: f32[8,1], index: 9, kind: output, shape index: {1}]  }
   0x1   :  { %v40_v0 = vld [vmem:[%s724_s4 + $0x3] sm:$0x1]  ;;  %v44_v1 = vld [vmem:[%s724_s4 + $0x7] sm:$0x1]  ;;  %v443_v5 = vld [vmem:[%s725_s5 + $0x6c] sm:$0xf0] }
   0x2   :  { %v45_v2 = vadd.f32 1e-05, %v40_v0  ;;  %v57_v3 = vadd.f32 1e-05, %v44_v1  ;;  %v411_v4 = vld [vmem:[%s725_s5 + $0x60] sm:$0xf] }
   0x3   :  { %v441_v6 = vld [vmem:[%s725_s5 + $0x64] sm:$0xf]  ;;  %v413_v7 = vld [vmem:[%s725_s5 + $0x70] sm:$0xf0]  ;;  %v412_v8 = vor.u32 %v443_v5, %v411_v4  ;;  %v419_v10 = vld [vmem:[%s725_s5 + $0x68] sm:$0xf] }
   0x4   :  { %454 = vrsqrt.f32 %v45_v2  ;;  %v416_v9 = vor.u32 %v441_v6, %v413_v7  ;;  %v444_v11 = vld [vmem:[%s725_s5 + $0x74] sm:$0xf0]  ;;  %v442_v12 = vld [vmem:[%s725_s5 + $0x6c] sm:$0xf]  ;;  %v421_v14 = vld [vmem:[%s725_s5 + $0x78] sm:$0xf0] }
   0x5   :  { %456 = vrsqrt.f32 %v57_v3  ;;  %v420_v13 = vor.u32 %v444_v11, %v419_v10 }
   0x6   :  { %15 = vsyncpa [#allocation5], 0  ;;  %213 = vmatpush.bf16.msra.mxu0 %v412_v8  ;;  %226 = vmatpush.bf16.msra.mxu1 %v416_v9  ;;  %v424_v15 = vor.u32 %v442_v12, %v421_v14  ;;  %vm52_vm0 = vweird.f32 %v45_v2  ;;  %vm64_vm2 = vweird.f32 %v57_v3  ;;  %v37_v24 = vld [vmem:[%s724_s4] sm:$0x1]  ;;  %v450_v28 = vld [vmem:[%s724_s4 + $0x2] ss:$0 sm:$0xff] }
   0x7   :  { %239 = vmatpush.bf16.msra.mxu2 %v420_v13  ;;  %v69_v27 = vld [vmem:[%s720_s0] sm:$0xff]  ;;  %v439_v62 = vld [vmem:[%s725_s5 + $0x4c] sm:$0xf0]  ;;  %v440_v4 = vld [vmem:[%s725_s5 + $0x54] sm:$0xf0]  ;;  %vm101_vm6 = vcmask 261120  }
   0x8   :  { %252 = vmatpush.bf16.msra.mxu3 %v424_v15  ;;  %v76_v30 = vld [vmem:[%s722_s2] sm:$0xff]  ;;  %v71_v39 = vsub.f32 %v69_v27, %v450_v28  ;;  %v438_v7 = vld [vmem:[%s725_s5 + $0x4c] sm:$0xf]  ;;  %v405_v8 = vld [vmem:[%s725_s5 + $0x58] sm:$0xf0]  ;;  %vm104_vm7 = vcmask 519168  }
   0x9   :  { %v452_v31 = vld [vmem:[%s724_s4 + $0x6] ss:$0 sm:$0xff]  ;;  %v41_v32 = vld [vmem:[%s724_s4 + $0x4] sm:$0x1]  ;;  %v77_v40 = vsub.f32 %v76_v30, %v450_v28  ;;  %v451_v45 = vld [vmem:[%s724_s4 + $0x1] ss:$0 sm:$0xff]  ;;  %v408_v9 = vor.u32 %v438_v7, %v405_v8 }
   0xa   :  { %v455_v16 = vpop.eup %454  ;;  %v80_v34 = vld [vmem:[%s721_s1] sm:$0xff]  ;;  %v435_v11 = vld [vmem:[%s725_s5 + $0x2c] sm:$0xf0]  ;;  %v381_v14 = vld [vmem:[%s725_s5 + $0x30] sm:$0xf0]  ;;  %vm205_vm8 = vcmask 523264  }
   0xb   :  { %v457_v17 = vpop.eup %456  ;;  %v47_v18 = vmul.f32 %v455_v16, %v45_v2  ;;  %vm53_vm1 = vweird.f32 %v455_v16  ;;  %v87_v35 = vld [vmem:[%s723_s3] sm:$0xff]  ;;  %v82_v42 = vsub.f32 %v80_v34, %v452_v31  ;;  %s500_s3 = smov 32   ;;  %v397_v2 = vld [vmem:[%s725_s5 + $0x50] sm:$0xf0]  ;;  %v387_v15 = vld [vmem:[%s725_s5 + $0x28] sm:$0xf] }
   0xc   :  { %v59_v19 = vmul.f32 %v457_v17, %v57_v3  ;;  %vm65_vm3 = vweird.f32 %v457_v17  ;;  %vm54_vm4 = vmor %vm52_vm0, %vm53_vm1  ;;  %v88_v43 = vsub.f32 %v87_v35, %v452_v31  ;;  %v453_v47 = vld [vmem:[%s724_s4 + $0x5] ss:$0 sm:$0xff]  ;;  %v395_v61 = vld [vmem:[%s725_s5 + $0x40] sm:$0xf]  ;;  %253 = vmatpush.bf16.msra.mxu3 %v408_v9  ;;  %v501_v35 = vmov 0   ;;  %s348_s10 = sshll.u32 %s728_s8, 4  ;;  %s349_s10 = int_to_ptr.hbm [resolvable:$true] %s348_s10 }
   0xd   :  { %v48_v20 = vmul.f32 %v455_v16, %v47_v18  ;;  %vm66_vm5 = vmor %vm64_vm2, %vm65_vm3  ;;  %v437_v63 = vld [vmem:[%s725_s5 + $0x44] sm:$0xf]  ;;  %v396_v1 = vor.u32 %v439_v62, %v395_v61  ;;  %v403_v3 = vld [vmem:[%s725_s5 + $0x48] sm:$0xf]  ;;  %449 = vset.pattern.permute.xlu0 %v501_v35  ;;  %vm106_vm9 = vcmask 7168  }
   0xe   :  { %v60_v21 = vmul.f32 %v457_v17, %v59_v19  ;;  %v400_v5 = vor.u32 %v437_v63, %v397_v2  ;;  %v404_v6 = vor.u32 %v440_v4, %v403_v3  ;;  %v379_v10 = vld [vmem:[%s725_s5 + $0x20] sm:$0xf]  ;;  %v433_v12 = vld [vmem:[%s725_s5 + $0x24] sm:$0xf]  ;;  %v434_v19 = vld [vmem:[%s725_s5 + $0x2c] sm:$0xf] }
   0xf   :  { %v49_v22 = vmul.f32 0.5, %v48_v20  ;;  %214 = vmatpush.bf16.msra.mxu0 %v396_v1  ;;  %v380_v13 = vor.u32 %v435_v11, %v379_v10  ;;  %v389_v20 = vld [vmem:[%s725_s5 + $0x38] sm:$0xf0]  ;;  %v371_v28 = vld [vmem:[%s725_s5 + $0x8] sm:$0xf]  ;;  %v261_v34 = vld [vmem:[%s726_s6] sm:$0xff] }
  0x10   :  { %v61_v23 = vmul.f32 0.5, %v60_v21  ;;  %227 = vmatpush.bf16.msra.mxu1 %v400_v5  ;;  %240 = vmatpush.bf16.msra.mxu2 %v404_v6  ;;  %v363_v21 = vld [vmem:[%s725_s5] sm:$0xf]  ;;  %v430_v30 = vld [vmem:[%s725_s5 + $0xc] sm:$0xf] }
  0x11   :  { %v50_v25 = vsub.f32 1.5, %v49_v22  ;;  %v392_v22 = vor.u32 %v434_v19, %v389_v20  ;;  %v283_v2 = vld [vmem:[%s727_s7] sm:$0xff]  ;;  %v284_v3 = vld [vmem:[%s727_s7 + $0x8] sm:$0xff] }
  0x12   :  { %v62_v26 = vsub.f32 1.5, %v61_v23  ;;  %v431_v23 = vld [vmem:[%s725_s5 + $0xc] sm:$0xf0]  ;;  %v312_v6 = vsub.f32 1.0, %v283_v2  ;;  %v313_v7 = vsub.f32 1.0, %v284_v3 }
  0x13   :  { %v51_v29 = vmul.f32 %v455_v16, %v50_v25  ;;  %215 = vmatpush.bf16.msra.mxu0 %v380_v13  ;;  %v365_v25 = vld [vmem:[%s725_s5 + $0x10] sm:$0xf0]  ;;  %254 = vmatpush.bf16.msra.mxu3 %v392_v22 }
  0x14   :  { %v63_v33 = vmul.f32 %v457_v17, %v62_v26  ;;  %v364_v26 = vor.u32 %v431_v23, %v363_v21  ;;  %v286_v23 = vld [vmem:[%s727_s7 + $0x18] sm:$0xff] }
  0x15   :  { %v55_v36 = vsel %vm54_vm4, %v455_v16, %v51_v29  ;;  %v436_v16 = vld [vmem:[%s725_s5 + $0x34] sm:$0xf0] }
  0x16   :  { %v56_v37 = vmul.f32 %v55_v36, %v37_v24  ;;  %v67_v38 = vsel %vm66_vm5, %v457_v17, %v63_v33  ;;  %v384_v17 = vor.u32 %v433_v12, %v381_v14  ;;  %v388_v18 = vor.u32 %v436_v16, %v387_v15  ;;  %v429_v24 = vld [vmem:[%s725_s5 + $0x4] sm:$0xf]  ;;  %v432_v29 = vld [vmem:[%s725_s5 + $0x14] sm:$0xf0] }
  0x17   :  { %v68_v41 = vmul.f32 %v67_v38, %v41_v32  ;;  %v368_v27 = vor.u32 %v429_v24, %v365_v25  ;;  %v372_v31 = vor.u32 %v432_v29, %v371_v28  ;;  %v373_v32 = vld [vmem:[%s725_s5 + $0x18] sm:$0xf0]  ;;  %216 = vmatpush.bf16.msra.mxu0 %v364_v26  ;;  %v315_v29 = vsub.f32 1.0, %v286_v23 }
  0x18   :  { %v72_v44 = vperm.slane %v56_v37, 0  ;;  %228 = vmatpush.bf16.msra.mxu1 %v384_v17  ;;  %241 = vmatpush.bf16.msra.mxu2 %v388_v18  ;;  %v376_v33 = vor.u32 %v430_v30, %v373_v32  ;;  %v285_v17 = vld [vmem:[%s727_s7 + $0x10] sm:$0xff]  ;;  %s503_s7 = smov [#allocation4]  }
  0x19   :  { %v83_v46 = vperm.slane %v68_v41, 0  ;;  %v314_v20 = vsub.f32 1.0, %v285_v17  ;;  %s346_s28 = sshll.u32 %s503_s7, 4  ;;  %s347_s28 = int_to_ptr.vmem [resolvable:$true] %s346_s28 }
  0x1a   :  { %v73_v48 = vmul.f32 %v72_v44, %v71_v39  ;;  %v78_v49 = vmul.f32 %v77_v40, %v72_v44  ;;  %255 = vmatpush.bf16.msra.mxu3 %v376_v33 }
  0x1b   :  { %v84_v50 = vmul.f32 %v83_v46, %v82_v42  ;;  %v89_v51 = vmul.f32 %v88_v43, %v83_v46 }
  0x1c   :  { %v75_v52 = vadd.f32 %v451_v45, %v73_v48  ;;  %v79_v53 = vadd.f32 %v451_v45, %v78_v49  ;;  %229 = vmatpush.bf16.msra.mxu1 %v368_v27  ;;  %242 = vmatpush.bf16.msra.mxu2 %v372_v31 }
  0x1d   :  { %v86_v54 = vadd.f32 %v453_v47, %v84_v50  ;;  %v90_v55 = vadd.f32 %v453_v47, %v89_v51 }
  0x1e   :  { %v614_v56 = vmul.f32 %v79_v53, %v75_v52 }
  0x1f   :  { %v616_v57 = vmul.f32 %v90_v55, %v86_v54  ;;  %v94_v58 = vmul.f32 %v90_v55, %v75_v52  ;;  %v95_v59 = vmul.f32 %v86_v54, %v79_v53 }
  0x21   :  { %v96_v60 = vadd.f32 %v95_v59, %v94_v58  ;;  %v93_v0 = vsub.f32 %v614_v56, %v616_v57  ;;  %v502_v59 = vmov 0.0  }
  0x22   :  { %107 = vst.msk [vmem:[#allocation3] sm:$0xff] %vm106_vm9, %v502_v59 }
  0x23   :  { %98 = vrot.lane.b32.xlu0 %v96_v60, %s500_s3 }
  0x2b   :  { %264 = vperm.xlu0 %449, %v261_v34  }
  0x95   :  { %v99_v36 = vpop.permute.xlu0 %98 }
  0x96   :  { %v102_v37 = vsel %vm101_vm6, %v93_v0, %v99_v36 }
  0x97   :  { %v103_v38 = vpack.c.bf16 %v102_v37, %v102_v37 }
  0x99   :  { %105 = vst.msk [vmem:[#allocation2] sm:$0xf] %vm104_vm7, %v103_v38 }
  0x9d   :  { %v265_v40 = vpop.permute.xlu0 %264 }
  0xa0   :  { %v108_v39 = vld [vmem:[#allocation2] sm:$0xf] }
  0xa1   :  { %425 = vmatmul.msk.bf16.vlgmr.msra.gmra.mxu0 %vm205_vm8, %v108_v39  ;;  %426 = vmatmul.msk.bf16.vlgmr.msra.gmra.mxu1 %vm205_vm8, %v108_v39 }
  0xa2   :  { %427 = vmatmul.msk.bf16.vlgmr.msra.gmra.mxu2 %vm205_vm8, %v108_v39  ;;  %428 = vmatmul.msk.bf16.vlgmr.msra.gmra.mxu3 %vm205_vm8, %v108_v39 }
 0x11e   :  { %v218_v41 = vpop.f32.mrf.mxu0  ;;  %v231_v42 = vpop.f32.mrf.mxu1 }
 0x11f   :  { %v267_v43 = vsub.f32 %v218_v41, %v265_v40  ;;  %v268_v44 = vsub.f32 %v231_v42, %v265_v40 }
 0x121   :  { %v271_v45 = vmul.f32 1.442695, %v267_v43  ;;  %v273_v46 = vmul.f32 1.442695, %v268_v44  ;;  %v287_v9 = vmax.f32 %v267_v43, -100.0  ;;  %v288_v10 = vmax.f32 %v268_v44, -100.0 }
 0x123   :  { %458 = vpow2.f32 %v271_v45  ;;  %v308_v15 = vmul.f32 %v287_v9, %v283_v2  ;;  %v309_v16 = vmul.f32 %v288_v10, %v284_v3  ;;  %v307_v45 = vld [vmem:[#allocation3] sm:$0xff] }
 0x124   :  { %460 = vpow2.f32 %v273_v46 }
 0x125   :  { %v244_v47 = vpop.f32.mrf.mxu2  ;;  %v257_v48 = vpop.f32.mrf.mxu3 }
 0x126   :  { %v269_v49 = vsub.f32 %v244_v47, %v265_v40  ;;  %v695_v50 = vsub.f32 %v257_v48, %v265_v40  ;;  %v220_v51 = vpop.f32.mrf.mxu0  ;;  %v233_v52 = vpop.f32.mrf.mxu1 }
 0x128   :  { %v275_v53 = vmul.f32 1.442695, %v269_v49  ;;  %v277_v54 = vmul.f32 1.442695, %v695_v50  ;;  %v289_v22 = vmax.f32 %v269_v49, -100.0  ;;  %v290_v27 = vmax.f32 %v695_v50, -100.0 }
 0x129   :  { %v459_v55 = vpop.eup %458 }
 0x12a   :  { %v461_v56 = vpop.eup %460  ;;  %279 = vst [vmem:[#allocation4] sm:$0xff] %v459_v55  ;;  %v291_v57 = vsub.f32 1.0, %v459_v55  ;;  %462 = vpow2.f32 %v275_v53  ;;  %v310_v32 = vmul.f32 %v289_v22, %v285_v17  ;;  %v311_v36 = vmul.f32 %v290_v27, %v286_v23 }
 0x12b   :  { %280 = vst [vmem:[#allocation4 + $0x8] sm:$0xff] %v461_v56  ;;  %v292_v58 = vsub.f32 1.0, %v461_v56  ;;  %464 = vpow2.f32 %v277_v54 }
 0x12c   :  { %466 = vlog2.f32 %v291_v57 }
 0x12d   :  { %468 = vlog2.f32 %v292_v58  ;;  %v246_v60 = vpop.f32.mrf.mxu2  ;;  %v259_v61 = vpop.f32.mrf.mxu3 }
 0x130   :  { %v463_v62 = vpop.eup %462 }
 0x131   :  { %v465_v63 = vpop.eup %464  ;;  %281 = vst [vmem:[#allocation4 + $0x10] sm:$0xff] %v463_v62  ;;  %v293_v0 = vsub.f32 1.0, %v463_v62 }
 0x132   :  { %v467_v1 = vpop.eup %466  ;;  %282 = vst [vmem:[#allocation4 + $0x18] sm:$0xff] %v465_v63  ;;  %v294_v4 = vsub.f32 1.0, %v465_v63 }
 0x133   :  { %v469_v5 = vpop.eup %468  ;;  %470 = vlog2.f32 %v293_v0  ;;  %v296_v8 = vmul.f32 0.6931472, %v467_v1  ;;  %351 = dma.vmem_to_hbm [thread:$0]  %s347_s28, 512, %s349_s10, [#allocation5]  }
 0x134   :  { %v298_v11 = vmul.f32 0.6931472, %v469_v5  ;;  %472 = vlog2.f32 %v294_v4 }
 0x135   :  { %v303_v12 = vmax.f32 %v296_v8, -100.0 }
 0x136   :  { %v304_v13 = vmax.f32 %v298_v11, -100.0 }
 0x137   :  { %v316_v14 = vmul.f32 %v312_v6, %v303_v12 }
 0x138   :  { %v317_v18 = vmul.f32 %v313_v7, %v304_v13 }
 0x139   :  { %v471_v19 = vpop.eup %470  ;;  %v320_v25 = vadd.f32 %v316_v14, %v308_v15 }
 0x13a   :  { %v473_v21 = vpop.eup %472  ;;  %v300_v24 = vmul.f32 0.6931472, %v471_v19  ;;  %v321_v26 = vadd.f32 %v317_v18, %v309_v16 }
 0x13b   :  { %v302_v28 = vmul.f32 0.6931472, %v473_v21  ;;  %v324_v34 = vsub.f32 0.0, %v320_v25 }
 0x13c   :  { %v305_v30 = vmax.f32 %v300_v24, -100.0  ;;  %v325_v35 = vsub.f32 0.0, %v321_v26 }
 0x13d   :  { %v306_v31 = vmax.f32 %v302_v28, -100.0 }
 0x13e   :  { %v318_v33 = vmul.f32 %v314_v20, %v305_v30  ;;  %v328_v41 = vadd.f32 %v325_v35, %v324_v34 }
 0x13f   :  { %v319_v37 = vmul.f32 %v315_v29, %v306_v31 }
 0x140   :  { %v322_v38 = vadd.f32 %v318_v33, %v310_v32 }
 0x141   :  { %v323_v39 = vadd.f32 %v319_v37, %v311_v36 }
 0x142   :  { %v326_v40 = vsub.f32 0.0, %v322_v38 }
 0x143   :  { %v327_v42 = vsub.f32 0.0, %v323_v39 }
 0x144   :  { %v329_v43 = vadd.f32 %v328_v41, %v326_v40 }
 0x146   :  { %v330_v44 = vadd.f32 %v329_v43, %v327_v42 }
 0x148   :  { %331 = vadd.xlane.f32.xlu1 %v330_v44 }
 0x1bb   :  { %v332_v46 = vpop.xlane.xlu1 %331 }
 0x1bc   :  { %v333_v47 = vadd.f32 %v332_v46, %v307_v45 }
 0x1be   :  { %335 = vst.msk [vmem:[#allocation3] sm:$0xff] %vm106_vm9, %v333_v47 }
 0x1c5   :  { %v339_v48 = vld [vmem:[#allocation3] sm:$0xff] }
 0x1c6   :  { %340 = vst.msk [vmem:[%s729_s9] sm:$0xff] %vm106_vm9, %v339_v48 }
 0x1c7   :  { %498 = dma.done.wait [#allocation5], 512  }
 0x1c8   :  { %499 = vsyncadd [#allocation5], 4294966784 }
 0x1c9   :  { %360 = vsyncpa [#allocation5], 1 }

// kernel: complexex_forward.2
= control target key start
LH: loop header
LB: loop body
LE: loop exit
PB: predicated region body
PF: predicated region fallthrough
CT: control target
= control target key end

     0   :  { %vm92_vm6 = vcmask 261120   ;;  %vm95_vm7 = vcmask 519168   ;;  %vm197_vm8 = vcmask 523264   ;;  %vm97_vm9 = vcmask 7168   ;;  %s593_s4 = inlined_call_operand.vmem [shape: f32[8,32], index: 4, kind: input, shape index: {}]   ;;  %s594_s5 = inlined_call_operand.vmem [shape: bf16[64,512], index: 5, kind: input, shape index: {}]   ;;  %s595_s0 = inlined_call_operand.vmem [shape: f32[8,32], index: 0, kind: input, shape index: {}]   ;;  %s596_s2 = inlined_call_operand.vmem [shape: f32[8,32], index: 2, kind: input, shape index: {}]   ;;  %s597_s1 = inlined_call_operand.vmem [shape: f32[8,32], index: 1, kind: input, shape index: {}]   ;;  %s598_s3 = inlined_call_operand.vmem [shape: f32[8,32], index: 3, kind: input, shape index: {}]   ;;  %s599_s6 = inlined_call_operand.vmem [shape: f32[8,1], index: 6, kind: output, shape index: {}]  }
   0x1   :  { %v31_v0 = vld [vmem:[%s593_s4 + $0x3] sm:$0x1]  ;;  %v35_v1 = vld [vmem:[%s593_s4 + $0x7] sm:$0x1]  ;;  %v386_v5 = vld [vmem:[%s594_s5 + $0x6c] sm:$0xf0] }
   0x2   :  { %v36_v2 = vadd.f32 1e-05, %v31_v0  ;;  %v48_v3 = vadd.f32 1e-05, %v35_v1  ;;  %v354_v4 = vld [vmem:[%s594_s5 + $0x60] sm:$0xf] }
   0x3   :  { %v384_v6 = vld [vmem:[%s594_s5 + $0x64] sm:$0xf]  ;;  %v356_v7 = vld [vmem:[%s594_s5 + $0x70] sm:$0xf0]  ;;  %v355_v8 = vor.u32 %v386_v5, %v354_v4  ;;  %v362_v10 = vld [vmem:[%s594_s5 + $0x68] sm:$0xf] }
   0x4   :  { %398 = vrsqrt.f32 %v36_v2  ;;  %v359_v9 = vor.u32 %v384_v6, %v356_v7  ;;  %v387_v11 = vld [vmem:[%s594_s5 + $0x74] sm:$0xf0]  ;;  %v385_v12 = vld [vmem:[%s594_s5 + $0x6c] sm:$0xf]  ;;  %v364_v14 = vld [vmem:[%s594_s5 + $0x78] sm:$0xf0]  ;;  %vm43_vm0 = vweird.f32 %v36_v2  ;;  %vm55_vm2 = vweird.f32 %v48_v3 }
   0x5   :  { %400 = vrsqrt.f32 %v48_v3  ;;  %v363_v13 = vor.u32 %v387_v11, %v362_v10  ;;  %205 = vmatpush.bf16.msra.mxu0 %v355_v8  ;;  %v367_v15 = vor.u32 %v385_v12, %v364_v14  ;;  %v28_v24 = vld [vmem:[%s593_s4] sm:$0x1]  ;;  %v394_v28 = vld [vmem:[%s593_s4 + $0x2] ss:$0 sm:$0xff]  ;;  %v396_v31 = vld [vmem:[%s593_s4 + $0x6] ss:$0 sm:$0xff] }
   0x6   :  { %218 = vmatpush.bf16.msra.mxu1 %v359_v9  ;;  %v60_v27 = vld [vmem:[%s595_s0] sm:$0xff]  ;;  %v382_v62 = vld [vmem:[%s594_s5 + $0x4c] sm:$0xf0]  ;;  %v383_v4 = vld [vmem:[%s594_s5 + $0x54] sm:$0xf0] }
   0x7   :  { %231 = vmatpush.bf16.msra.mxu2 %v363_v13  ;;  %244 = vmatpush.bf16.msra.mxu3 %v367_v15  ;;  %v67_v30 = vld [vmem:[%s596_s2] sm:$0xff]  ;;  %v62_v39 = vsub.f32 %v60_v27, %v394_v28  ;;  %v381_v7 = vld [vmem:[%s594_s5 + $0x4c] sm:$0xf]  ;;  %v348_v8 = vld [vmem:[%s594_s5 + $0x58] sm:$0xf0] }
   0x8   :  { %v32_v32 = vld [vmem:[%s593_s4 + $0x4] sm:$0x1]  ;;  %v68_v40 = vsub.f32 %v67_v30, %v394_v28  ;;  %v395_v45 = vld [vmem:[%s593_s4 + $0x1] ss:$0 sm:$0xff]  ;;  %v397_v47 = vld [vmem:[%s593_s4 + $0x5] ss:$0 sm:$0xff]  ;;  %v351_v9 = vor.u32 %v381_v7, %v348_v8 }
   0x9   :  { %v71_v34 = vld [vmem:[%s597_s1] sm:$0xff]  ;;  %v378_v11 = vld [vmem:[%s594_s5 + $0x2c] sm:$0xf0]  ;;  %v324_v14 = vld [vmem:[%s594_s5 + $0x30] sm:$0xf0] }
   0xa   :  { %v399_v16 = vpop.eup %398  ;;  %v78_v35 = vld [vmem:[%s598_s3] sm:$0xff]  ;;  %v73_v42 = vsub.f32 %v71_v34, %v396_v31  ;;  %s414_s3 = smov 32   ;;  %v330_v15 = vld [vmem:[%s594_s5 + $0x28] sm:$0xf]  ;;  %v373_v30 = vld [vmem:[%s594_s5 + $0xc] sm:$0xf] }
   0xb   :  { %v401_v17 = vpop.eup %400  ;;  %v38_v18 = vmul.f32 %v399_v16, %v36_v2  ;;  %vm44_vm1 = vweird.f32 %v399_v16  ;;  %v79_v43 = vsub.f32 %v78_v35, %v396_v31  ;;  %v338_v61 = vld [vmem:[%s594_s5 + $0x40] sm:$0xf]  ;;  %v380_v63 = vld [vmem:[%s594_s5 + $0x44] sm:$0xf]  ;;  %v340_v2 = vld [vmem:[%s594_s5 + $0x50] sm:$0xf0]  ;;  %245 = vmatpush.bf16.msra.mxu3 %v351_v9 }
   0xc   :  { %v50_v19 = vmul.f32 %v401_v17, %v48_v3  ;;  %vm56_vm3 = vweird.f32 %v401_v17  ;;  %vm45_vm4 = vmor %vm43_vm0, %vm44_vm1  ;;  %v339_v1 = vor.u32 %v382_v62, %v338_v61  ;;  %v346_v3 = vld [vmem:[%s594_s5 + $0x48] sm:$0xf]  ;;  %v343_v5 = vor.u32 %v380_v63, %v340_v2  ;;  %v322_v10 = vld [vmem:[%s594_s5 + $0x20] sm:$0xf] }
   0xd   :  { %v39_v20 = vmul.f32 %v399_v16, %v38_v18  ;;  %vm57_vm5 = vmor %vm55_vm2, %vm56_vm3  ;;  %v347_v6 = vor.u32 %v383_v4, %v346_v3  ;;  %v376_v12 = vld [vmem:[%s594_s5 + $0x24] sm:$0xf]  ;;  %v323_v13 = vor.u32 %v378_v11, %v322_v10  ;;  %v314_v28 = vld [vmem:[%s594_s5 + $0x8] sm:$0xf] }
   0xe   :  { %v51_v21 = vmul.f32 %v401_v17, %v50_v19  ;;  %206 = vmatpush.bf16.msra.mxu0 %v339_v1  ;;  %219 = vmatpush.bf16.msra.mxu1 %v343_v5  ;;  %v377_v19 = vld [vmem:[%s594_s5 + $0x2c] sm:$0xf] }
   0xf   :  { %v40_v22 = vmul.f32 0.5, %v39_v20  ;;  %232 = vmatpush.bf16.msra.mxu2 %v347_v6  ;;  %v332_v20 = vld [vmem:[%s594_s5 + $0x38] sm:$0xf0] }
  0x10   :  { %v52_v23 = vmul.f32 0.5, %v51_v21  ;;  %v306_v21 = vld [vmem:[%s594_s5] sm:$0xf] }
  0x11   :  { %v41_v25 = vsub.f32 1.5, %v40_v22  ;;  %v335_v22 = vor.u32 %v377_v19, %v332_v20 }
  0x12   :  { %v53_v26 = vsub.f32 1.5, %v52_v23  ;;  %207 = vmatpush.bf16.msra.mxu0 %v323_v13  ;;  %v374_v23 = vld [vmem:[%s594_s5 + $0xc] sm:$0xf0] }
  0x13   :  { %v42_v29 = vmul.f32 %v399_v16, %v41_v25  ;;  %v308_v25 = vld [vmem:[%s594_s5 + $0x10] sm:$0xf0]  ;;  %246 = vmatpush.bf16.msra.mxu3 %v335_v22 }
  0x14   :  { %v54_v33 = vmul.f32 %v401_v17, %v53_v26  ;;  %v307_v26 = vor.u32 %v374_v23, %v306_v21 }
  0x15   :  { %v46_v36 = vsel %vm45_vm4, %v399_v16, %v42_v29  ;;  %v379_v16 = vld [vmem:[%s594_s5 + $0x34] sm:$0xf0] }
  0x16   :  { %v47_v37 = vmul.f32 %v46_v36, %v28_v24  ;;  %v58_v38 = vsel %vm57_vm5, %v401_v17, %v54_v33  ;;  %v327_v17 = vor.u32 %v376_v12, %v324_v14  ;;  %v331_v18 = vor.u32 %v379_v16, %v330_v15  ;;  %v372_v24 = vld [vmem:[%s594_s5 + $0x4] sm:$0xf]  ;;  %v375_v29 = vld [vmem:[%s594_s5 + $0x14] sm:$0xf0]  ;;  %208 = vmatpush.bf16.msra.mxu0 %v307_v26 }
  0x17   :  { %v59_v41 = vmul.f32 %v58_v38, %v32_v32  ;;  %v311_v27 = vor.u32 %v372_v24, %v308_v25  ;;  %v315_v31 = vor.u32 %v375_v29, %v314_v28  ;;  %v316_v32 = vld [vmem:[%s594_s5 + $0x18] sm:$0xf0]  ;;  %v415_v38 = vmov -inf  }
  0x18   :  { %v63_v44 = vperm.slane %v47_v37, 0  ;;  %220 = vmatpush.bf16.msra.mxu1 %v327_v17  ;;  %233 = vmatpush.bf16.msra.mxu2 %v331_v18  ;;  %v319_v33 = vor.u32 %v373_v30, %v316_v32  ;;  %98 = vst.msk [vmem:[#allocation3] sm:$0xff] %vm97_vm9, %v415_v38 }
  0x19   :  { %v74_v46 = vperm.slane %v59_v41, 0 }
  0x1a   :  { %v64_v48 = vmul.f32 %v63_v44, %v62_v39  ;;  %v69_v49 = vmul.f32 %v68_v40, %v63_v44  ;;  %247 = vmatpush.bf16.msra.mxu3 %v319_v33 }
  0x1b   :  { %v75_v50 = vmul.f32 %v74_v46, %v73_v42  ;;  %v80_v51 = vmul.f32 %v79_v43, %v74_v46 }
  0x1c   :  { %v66_v52 = vadd.f32 %v395_v45, %v64_v48  ;;  %v70_v53 = vadd.f32 %v395_v45, %v69_v49  ;;  %221 = vmatpush.bf16.msra.mxu1 %v311_v27  ;;  %234 = vmatpush.bf16.msra.mxu2 %v315_v31 }
  0x1d   :  { %v77_v54 = vadd.f32 %v397_v47, %v75_v50  ;;  %v81_v55 = vadd.f32 %v397_v47, %v80_v51  ;;  %v416_v50 = vmov 0   ;;  %v417_v51 = vmov 0.0  }
  0x1e   :  { %v82_v56 = vmul.f32 %v70_v53, %v66_v52  ;;  %392 = vset.pattern.permute.xlu1 %v416_v50  ;;  %393 = vset.pattern.permute.xlu0 %v416_v50  ;;  %99 = vst.msk [vmem:[#allocation4] sm:$0xff] %vm97_vm9, %v417_v51 }
  0x1f   :  { %v83_v57 = vmul.f32 %v81_v55, %v77_v54  ;;  %v85_v58 = vmul.f32 %v81_v55, %v66_v52  ;;  %v86_v59 = vmul.f32 %v77_v54, %v70_v53  ;;  %v253_v52 = vld [vmem:[#allocation3] sm:$0xff] }
  0x21   :  { %v87_v60 = vadd.f32 %v86_v59, %v85_v58  ;;  %v84_v0 = vsub.f32 %v82_v56, %v83_v57 }
  0x23   :  { %89 = vrot.lane.b32.xlu0 %v87_v60, %s414_s3 }
  0x25   :  { %v260_v10 = vld [vmem:[#allocation4] sm:$0xff] }
  0x95   :  { %v90_v34 = vpop.permute.xlu0 %89 }
  0x96   :  { %v93_v35 = vsel %vm92_vm6, %v84_v0, %v90_v34 }
  0x97   :  { %v94_v36 = vpack.c.bf16 %v93_v35, %v93_v35 }
  0x99   :  { %96 = vst.msk [vmem:[#allocation2] sm:$0xf] %vm95_vm7, %v94_v36 }
  0xa0   :  { %v100_v37 = vld [vmem:[#allocation2] sm:$0xf] }
  0xa1   :  { %368 = vmatmul.msk.bf16.vlgmr.msra.gmra.mxu0 %vm197_vm8, %v100_v37  ;;  %369 = vmatmul.msk.bf16.vlgmr.msra.gmra.mxu1 %vm197_vm8, %v100_v37 }
  0xa2   :  { %370 = vmatmul.msk.bf16.vlgmr.msra.gmra.mxu2 %vm197_vm8, %v100_v37  ;;  %371 = vmatmul.msk.bf16.vlgmr.msra.gmra.mxu3 %vm197_vm8, %v100_v37 }
 0x11e   :  { %v210_v39 = vpop.f32.mrf.mxu0  ;;  %v223_v40 = vpop.f32.mrf.mxu1 }
 0x11f   :  { %v254_v43 = vmax.f32 %v210_v39, %v223_v40 }
 0x125   :  { %v236_v41 = vpop.f32.mrf.mxu2  ;;  %v249_v42 = vpop.f32.mrf.mxu3 }
 0x126   :  { %v255_v44 = vmax.f32 %v236_v41, %v249_v42  ;;  %v212_v45 = vpop.f32.mrf.mxu0  ;;  %v225_v46 = vpop.f32.mrf.mxu1 }
 0x128   :  { %v256_v47 = vmax.f32 %v254_v43, %v255_v44 }
 0x12a   :  { %257 = vmax.xlane.f32.xlu0 %v256_v47 }
 0x12d   :  { %v238_v48 = vpop.f32.mrf.mxu2  ;;  %v251_v49 = vpop.f32.mrf.mxu3 }
 0x19d   :  { %v258_v53 = vpop.xlane.xlu0 %257 }
 0x19e   :  { %v259_v54 = vmax.f32 %v253_v52, %v258_v53 }
 0x1a0   :  { %v261_v55 = vsub.f32 %v253_v52, %v259_v54  ;;  %290 = vst.msk [vmem:[#allocation3] sm:$0xff] %vm97_vm9, %v259_v54  ;;  %267 = vperm.xlu1 %392, %v259_v54  }
 0x1a2   :  { %v262_v8 = vmul.f32 1.442695, %v261_v55 }
 0x1a7   :  { %v294_v17 = vld [vmem:[#allocation3] sm:$0xff] }
 0x212   :  { %v268_v56 = vpop.permute.xlu1 %267 }
 0x213   :  { %v270_v57 = vsub.f32 %v210_v39, %v268_v56  ;;  %v271_v58 = vsub.f32 %v223_v40, %v268_v56  ;;  %v272_v59 = vsub.f32 %v236_v41, %v268_v56  ;;  %v273_v60 = vsub.f32 %v249_v42, %v268_v56 }
 0x215   :  { %v274_v61 = vmul.f32 1.442695, %v270_v57  ;;  %v276_v62 = vmul.f32 1.442695, %v271_v58  ;;  %v278_v63 = vmul.f32 1.442695, %v272_v59 }
 0x216   :  { %v280_v0 = vmul.f32 1.442695, %v273_v60 }
 0x217   :  { %402 = vpow2.f32 %v274_v61 }
 0x218   :  { %404 = vpow2.f32 %v276_v62 }
 0x219   :  { %406 = vpow2.f32 %v278_v63 }
 0x21a   :  { %408 = vpow2.f32 %v280_v0 }
 0x21b   :  { %410 = vpow2.f32 %v262_v8 }
 0x21d   :  { %v403_v1 = vpop.eup %402 }
 0x21e   :  { %v405_v2 = vpop.eup %404 }
 0x21f   :  { %v282_v3 = vadd.f32 %v405_v2, %v403_v1  ;;  %v407_v4 = vpop.eup %406 }
 0x220   :  { %v409_v6 = vpop.eup %408 }
 0x221   :  { %v283_v5 = vadd.f32 %v407_v4, %v282_v3  ;;  %v411_v9 = vpop.eup %410 }
 0x222   :  { %v264_v11 = vmul.f32 %v411_v9, %v260_v10 }
 0x223   :  { %v284_v7 = vadd.f32 %v409_v6, %v283_v5 }
 0x225   :  { %285 = vadd.xlane.f32.xlu1 %v284_v7 }
 0x298   :  { %v286_v12 = vpop.xlane.xlu1 %285 }
 0x299   :  { %v287_v13 = vadd.f32 %v286_v12, %v264_v11 }
 0x29b   :  { %289 = vst.msk [vmem:[#allocation4] sm:$0xff] %vm97_vm9, %v287_v13 }
 0x2a2   :  { %v295_v14 = vld [vmem:[#allocation4] sm:$0xff] }
 0x2a3   :  { %412 = vlog2.f32 %v295_v14 }
 0x2a9   :  { %v413_v15 = vpop.eup %412 }
 0x2aa   :  { %v297_v16 = vmul.f32 0.6931472, %v413_v15 }
 0x2ac   :  { %v298_v18 = vadd.f32 %v297_v16, %v294_v17 }
 0x2ae   :  { %299 = vst.msk [vmem:[%s599_s6] sm:$0xff] %vm97_vm9, %v298_v18 }

</bundles_post_ra>
